<compile_context>
chip_gen: v7x
topology: tpu7x:2x2x1
jax: 0.10.0
libtpu: 0.0.40
codegen_flags: <defaults>
</compile_context>

<pallas_src>
import functools

import jax
import jax.numpy as jnp
from jax.experimental import pallas as pl
from jax.experimental.pallas import tpu as pltpu

BN_EPS = 0.001  # nn.BatchNorm1d(n_hidden, momentum=0.01, eps=0.001)

_MIB = 1024 * 1024
_VMEM_BUDGET = 40 * _MIB   # tile-sizing budget; binding constraint is v7x (64 MiB/core)
_VMEM_CAP = 64 * _MIB      # never request a scoped limit above this


def _round_up(x: int, m: int) -> int:
    return (x + m - 1) // m * m


# --------------------------------------------------------------------------------------
# Kernel 1: Layer 0 = Linear (fused covariate injection) + BatchNorm1d + ReLU  -> bf16 h
# --------------------------------------------------------------------------------------
def layer0_kernel(x_ref, cov_ref, w1x_ref, w1c_ref, b1_ref, gamma_ref, beta_ref,
                  h_ref, *, b_real: int):
    # Fused covariate injection: concat([x, cov]) @ W1.T == x @ W1x + cov @ W1c.
    h = (jnp.dot(x_ref[...], w1x_ref[...], preferred_element_type=jnp.float32)
         + jnp.dot(cov_ref[...], w1c_ref[...], preferred_element_type=jnp.float32)
         + b1_ref[...])

    # BatchNorm1d, training-mode (biased) batch statistics. Masked two-pass centered
    # variance; zero-padded batch rows are excluded so statistics stay exact.
    inv_b = 1.0 / b_real
    if h.shape[0] != b_real:
        row = jax.lax.broadcasted_iota(jnp.int32, h.shape, 0)
        valid = row < b_real
        hm = jnp.where(valid, h, 0.0)
        mean = jnp.sum(hm, axis=0, keepdims=True) * inv_b
        d = jnp.where(valid, h - mean, 0.0)
    else:
        mean = jnp.sum(h, axis=0, keepdims=True) * inv_b
        d = h - mean
    var = jnp.sum(d * d, axis=0, keepdims=True) * inv_b
    hn = (h - mean) * jax.lax.rsqrt(var + BN_EPS) * gamma_ref[...] + beta_ref[...]

    # ReLU; Dropout is identity (inference semantics).
    # TODO(synk): training-mode dropout RNG masking not reproduced.
    h_ref[...] = jnp.maximum(hn, 0.0).astype(h_ref.dtype)


# --------------------------------------------------------------------------------------
# Kernel 2: linear_out, streamed along the (padded) output-feature axis.
# --------------------------------------------------------------------------------------
def linear_out_kernel(h_ref, w2_ref, b2_ref, out_ref):
    out_ref[...] = (jnp.dot(h_ref[...], w2_ref[...], preferred_element_type=jnp.float32)
                    + b2_ref[...]).astype(out_ref.dtype)


# --------------------------------------------------------------------------------------
# Parameter packing
# --------------------------------------------------------------------------------------
def pack_params(params, n_input: int, *, max_tn: int = 2048, batch_hint: int = 256,
                out_dtype=jnp.float32):
    """Pad feature dims to lane-dense multiples of 128, split W1 for fused covariate
    injection, cast matmul weights to bf16 (biases / BN affine stay f32), and pick an
    output tile width TN that fits the VMEM budget on every TPU generation."""
    w1t, w2t = params["w1t"], params["w2t"]
    fan1, n_hidden = w1t.shape
    n_cat = fan1 - n_input
    n_output = w2t.shape[1]

    h_pad = _round_up(n_hidden, 128)
    out_itemsize = jnp.dtype(out_dtype).itemsize
    b_hint = _round_up(batch_hint, 16)

    def vmem_estimate(t):
        return (b_hint * h_pad * 2             # resident h (bf16, single-buffered)
                + 2 * h_pad * t * 2            # streamed W2 tiles (bf16, double-buffered)
                + 2 * 8 * t * 4                # streamed b2 tiles
                + 2 * b_hint * t * out_itemsize)  # streamed out tiles

    tn = min(_round_up(max_tn, 128), _round_up(n_output, 128))
    while tn > 128 and vmem_estimate(tn) > _VMEM_BUDGET:
        tn -= 128
    n_pad = _round_up(n_output, tn)

    def pad2(a, rows, cols):
        return jnp.pad(a, ((0, rows - a.shape[0]), (0, cols - a.shape[1])))

    packed = {
        "w1x": pad2(w1t[:n_input], n_input, h_pad).astype(jnp.bfloat16),
        "w1c": pad2(w1t[n_input:], n_cat, h_pad).astype(jnp.bfloat16),
        "b1": pad2(params["b1"], 1, h_pad),
        "gamma": pad2(params["gamma"], 1, h_pad),
        "beta": pad2(params["beta"], 1, h_pad),
        "w2": pad2(w2t, h_pad, n_pad).astype(jnp.bfloat16),
        "b2": pad2(params["b2"], 1, n_pad),
    }
    meta = dict(n_input=n_input, n_cat=n_cat, n_hidden=n_hidden, n_output=n_output,
                h_pad=h_pad, n_pad=n_pad, tn=tn)
    return packed, meta


# --------------------------------------------------------------------------------------
# Forward wrapper
# --------------------------------------------------------------------------------------
def decoder_forward(x, cov, packed, meta, *, out_dtype=jnp.float32):
    """x: (B, n_input) f32, cov: (B, n_cat) f32 -> (B, n_output) out_dtype."""
    b = x.shape[0]
    b_pad = _round_up(b, 16)  # bf16 packs 16 rows per vreg sublane group
    if b_pad != b:
        x = jnp.pad(x, ((0, b_pad - b), (0, 0)))
        cov = jnp.pad(cov, ((0, b_pad - b), (0, 0)))
    # Pre-cast activations to bf16 (kernel math identical; halves DMA bytes).
    x = x.astype(jnp.bfloat16)
    cov = cov.astype(jnp.bfloat16)

    n_input, n_cat = meta["n_input"], meta["n_cat"]
    h_pad, n_pad, tn = meta["h_pad"], meta["n_pad"], meta["tn"]
    out_itemsize = jnp.dtype(out_dtype).itemsize

    # ---- Layer 0: single invocation, full batch resident (exact BN statistics) --------
    l0_bytes = (x.size * 2 + cov.size * 2
                + int(packed["w1x"].size) * 2 + int(packed["w1c"].size) * 2
                + 3 * h_pad * 4 + b_pad * h_pad * 2)
    l0_limit = int(min(_VMEM_CAP, max(16 * _MIB, 2 * l0_bytes)))
    l0_cost = pl.CostEstimate(
        flops=2 * b_pad * (n_input + n_cat) * h_pad,
        transcendentals=h_pad,
        bytes_accessed=int(l0_bytes))

    h = pl.pallas_call(
        functools.partial(layer0_kernel, b_real=b),
        out_shape=jax.ShapeDtypeStruct((b_pad, h_pad), jnp.bfloat16),
        compiler_params=pltpu.CompilerParams(vmem_limit_bytes=l0_limit),
        cost_estimate=l0_cost,
    )(x, cov, packed["w1x"], packed["w1c"], packed["b1"], packed["gamma"],
      packed["beta"])

    # ---- linear_out: output-feature-tiled GEMM, megacore-parallel grid ----------------
    grid = (n_pad // tn,)
    const = lambda j: (0, 0)   # resident operand (block index never changes)
    tiled = lambda j: (0, j)   # streamed along the output-feature axis

    gemm_bytes = (b_pad * h_pad * 2                 # resident h (single-buffered)
                  + 2 * h_pad * tn * 2              # streamed W2 tiles
                  + 2 * 8 * tn * 4                  # streamed b2 tiles
                  + 2 * b_pad * tn * out_itemsize)  # streamed out tiles
    gemm_limit = int(min(_VMEM_CAP, max(16 * _MIB, 2 * gemm_bytes)))
    gemm_cost = pl.CostEstimate(
        flops=2 * b_pad * h_pad * n_pad,
        transcendentals=0,
        bytes_accessed=int(b_pad * h_pad * 2 + int(packed["w2"].size) * 2
                           + int(packed["b2"].size) * 4 + b_pad * n_pad * out_itemsize))

    out = pl.pallas_call(
        linear_out_kernel,
        out_shape=jax.ShapeDtypeStruct((b_pad, n_pad), out_dtype),
        grid_spec=pltpu.PrefetchScalarGridSpec(
            num_scalar_prefetch=0,
            grid=grid,
            in_specs=[
                # h is resident across every output tile -> single buffer.
                pl.BlockSpec((b_pad, h_pad), const, pipeline_mode=pl.Buffered(1)),
                pl.BlockSpec((h_pad, tn), tiled),     # W2 tile (bf16, streamed)
                pl.BlockSpec((1, tn), tiled),         # b2 tile
            ],
            out_specs=pl.BlockSpec((b_pad, tn), tiled),  # lane-dense (TN multiple of 128)
        ),
        # Every grid step is independent (reads resident h, writes its own out tile),
        # so the output-feature axis can be sharded across v7x's two TensorCores.
        compiler_params=pltpu.CompilerParams(
            dimension_semantics=("parallel",),
            vmem_limit_bytes=gemm_limit,
        ),
        cost_estimate=gemm_cost,
    )(h, packed["w2"], packed["b2"])

    return out[:b, :meta["n_output"]]


# --------------------------------------------------------------------------------------
# Init + references
# --------------------------------------------------------------------------------------
def init_params(key, n_input, n_output, n_cat, n_hidden):
    """Deterministic init mirroring Decoder.initialize_weights:
    kaiming_uniform_(nonlinearity='relu') for Linear weights, zeros for biases,
    BatchNorm gamma=1, beta=0."""
    k1, k2 = jax.random.split(key)

    def kaiming_uniform(k, fan_in, shape):
        bound = (2.0 ** 0.5) * (3.0 / fan_in) ** 0.5  # gain * sqrt(3 / fan_in)
        return jax.random.uniform(k, shape, jnp.float32, -bound, bound)

    fan1 = n_input + n_cat
    w1 = kaiming_uniform(k1, fan1, (n_hidden, fan1))   # torch Linear weight: (out, in)
    w2 = kaiming_uniform(k2, n_hidden, (n_output, n_hidden))
    return {
        "w1t": w1.T,                                   # (fan1, n_hidden)
        "b1": jnp.zeros((1, n_hidden), jnp.float32),
        "gamma": jnp.ones((1, n_hidden), jnp.float32),
        "beta": jnp.zeros((1, n_hidden), jnp.float32),
        "w2t": w2.T,                                   # (n_hidden, n_output)
        "b2": jnp.zeros((1, n_output), jnp.float32),
    }


def reference_matched(x, cov, params, n_input):
    """Pure-JAX reference mimicking the kernel's numerics (bf16 MXU operands, f32 accum,
    masked two-pass centered batch stats)."""
    w1x = params["w1t"][:n_input].astype(jnp.bfloat16)
    w1c = params["w1t"][n_input:].astype(jnp.bfloat16)
    h = (jnp.dot(x.astype(jnp.bfloat16), w1x, preferred_element_type=jnp.float32)
         + jnp.dot(cov.astype(jnp.bfloat16), w1c, preferred_element_type=jnp.float32)
         + params["b1"])
    mean = h.mean(0, keepdims=True)
    var = ((h - mean) ** 2).mean(0, keepdims=True)
    h = (h - mean) * jax.lax.rsqrt(var + BN_EPS) * params["gamma"] + params["beta"]
    h = jnp.maximum(h, 0.0).astype(jnp.bfloat16)
    return (jnp.dot(h, params["w2t"].astype(jnp.bfloat16),
                    preferred_element_type=jnp.float32) + params["b2"])


def reference_f32(x, cov, params):
    """Full-precision reference of the PyTorch forward."""
    xc = jnp.concatenate([x, cov], axis=-1)
    h = xc @ params["w1t"] + params["b1"]
    m = h.mean(0, keepdims=True)
    v = ((h - m) ** 2).mean(0, keepdims=True)
    h = (h - m) / jnp.sqrt(v + BN_EPS) * params["gamma"] + params["beta"]
    h = jnp.maximum(h, 0.0)
    return h @ params["w2t"] + params["b2"]


if __name__ == "__main__":
    B, n_input, n_cat, n_hidden, n_output = 8, 16, 4, 32, 16

    key = jax.random.PRNGKey(0)
    kx, kc, kp = jax.random.split(key, 3)
    x = jax.random.normal(kx, (B, n_input), jnp.float32)
    cov = jax.random.normal(kc, (B, n_cat), jnp.float32)
    params = init_params(kp, n_input, n_output, n_cat, n_hidden)
    packed, meta = pack_params(params, n_input)

    out = decoder_forward(x, cov, packed, meta)
    out = jax.block_until_ready(out)

    assert out.shape == (B, n_output)
    # Tight check against a reference with matched bf16/f32 numerics.
    ref_b = reference_matched(x, cov, params, n_input)
    assert jnp.allclose(out, ref_b, atol=5e-3, rtol=5e-3), "mismatch vs bf16-matched ref"
    # Loose sanity check against the full-f32 PyTorch-equivalent math.
    ref_f = reference_f32(x, cov, params)
    assert jnp.allclose(out, ref_f, atol=1e-1, rtol=1e-1), "mismatch vs f32 ref"

    print("KERNEL_OK")
</pallas_src>

<mosaic_0001>
module attributes {stable_mosaic.version = 11 : i64} {
  func.func @layer0_kernel(%arg0: memref<16x16xbf16, #tpu.memory_space<vmem>>, %arg1: memref<16x4xbf16, #tpu.memory_space<vmem>>, %arg2: memref<16x128xbf16, #tpu.memory_space<vmem>>, %arg3: memref<4x128xbf16, #tpu.memory_space<vmem>>, %arg4: memref<1x128xf32, #tpu.memory_space<vmem>>, %arg5: memref<1x128xf32, #tpu.memory_space<vmem>>, %arg6: memref<1x128xf32, #tpu.memory_space<vmem>>, %arg7: memref<16x128xbf16, #tpu.memory_space<vmem>>) attributes {dimension_semantics = [], scalar_prefetch = 0 : i64, scratch_operands = 0 : i64, tpu.core_type = #tpu.core_type<tc>} {
    %c0 = arith.constant 0 : index
    %c0_0 = arith.constant 0 : index
    %0 = vector.load %arg0[%c0, %c0_0] : memref<16x16xbf16, #tpu.memory_space<vmem>>, vector<16x16xbf16>
    %c0_1 = arith.constant 0 : index
    %c0_2 = arith.constant 0 : index
    %1 = vector.load %arg2[%c0_1, %c0_2] : memref<16x128xbf16, #tpu.memory_space<vmem>>, vector<16x128xbf16>
    %cst = arith.constant dense<0.000000e+00> : vector<16x128xf32>
    %2 = tpu.matmul %0, %1, %cst {dimension_numbers = #tpu.dot_dimension_numbers<[1], [0], [0], [1], [0, 0, 1, 1], [], []>} : vector<16x16xbf16>, vector<16x128xbf16>, vector<16x128xf32> -> vector<16x128xf32>
    %c0_3 = arith.constant 0 : index
    %c0_4 = arith.constant 0 : index
    %3 = vector.load %arg1[%c0_3, %c0_4] : memref<16x4xbf16, #tpu.memory_space<vmem>>, vector<16x4xbf16>
    %c0_5 = arith.constant 0 : index
    %c0_6 = arith.constant 0 : index
    %4 = vector.load %arg3[%c0_5, %c0_6] : memref<4x128xbf16, #tpu.memory_space<vmem>>, vector<4x128xbf16>
    %cst_7 = arith.constant dense<0.000000e+00> : vector<16x128xf32>
    %5 = tpu.matmul %3, %4, %cst_7 {dimension_numbers = #tpu.dot_dimension_numbers<[1], [0], [0], [1], [0, 0, 1, 1], [], []>} : vector<16x4xbf16>, vector<4x128xbf16>, vector<16x128xf32> -> vector<16x128xf32>
    %6 = arith.addf %2, %5 : vector<16x128xf32>
    %c0_8 = arith.constant 0 : index
    %c0_9 = arith.constant 0 : index
    %7 = vector.load %arg4[%c0_8, %c0_9] : memref<1x128xf32, #tpu.memory_space<vmem>>, vector<1x128xf32>
    %8 = vector.broadcast %7 : vector<1x128xf32> to vector<16x128xf32>
    %9 = arith.addf %6, %8 : vector<16x128xf32>
    %10 = tpu.iota {dimensions = array<i32: 0>} : vector<16x128xi32>
    %c8_i32 = arith.constant 8 : i32
    %11 = vector.broadcast %c8_i32 : i32 to vector<16x128xi32>
    %12 = arith.cmpi slt, %10, %11 : vector<16x128xi32>
    %cst_10 = arith.constant 0.000000e+00 : f32
    %13 = vector.broadcast %cst_10 : f32 to vector<16x128xf32>
    %14 = arith.select %12, %9, %13 : vector<16x128xi1>, vector<16x128xf32>
    %cst_11 = arith.constant dense<0.000000e+00> : vector<128xf32>
    %15 = vector.multi_reduction <add>, %14, %cst_11 [0] : vector<16x128xf32> to vector<128xf32>
    %16 = vector.shape_cast %15 : vector<128xf32> to vector<1x128xf32>
    %cst_12 = arith.constant 1.250000e-01 : f32
    %17 = vector.broadcast %cst_12 : f32 to vector<1x128xf32>
    %18 = arith.mulf %16, %17 : vector<1x128xf32>
    %19 = vector.broadcast %18 : vector<1x128xf32> to vector<16x128xf32>
    %20 = arith.subf %9, %19 : vector<16x128xf32>
    %cst_13 = arith.constant 0.000000e+00 : f32
    %21 = vector.broadcast %cst_13 : f32 to vector<16x128xf32>
    %22 = arith.select %12, %20, %21 : vector<16x128xi1>, vector<16x128xf32>
    %23 = arith.mulf %22, %22 : vector<16x128xf32>
    %cst_14 = arith.constant dense<0.000000e+00> : vector<128xf32>
    %24 = vector.multi_reduction <add>, %23, %cst_14 [0] : vector<16x128xf32> to vector<128xf32>
    %25 = vector.shape_cast %24 : vector<128xf32> to vector<1x128xf32>
    %cst_15 = arith.constant 1.250000e-01 : f32
    %26 = vector.broadcast %cst_15 : f32 to vector<1x128xf32>
    %27 = arith.mulf %25, %26 : vector<1x128xf32>
    %28 = vector.broadcast %18 : vector<1x128xf32> to vector<16x128xf32>
    %29 = arith.subf %9, %28 : vector<16x128xf32>
    %cst_16 = arith.constant 1.000000e-03 : f32
    %30 = vector.broadcast %cst_16 : f32 to vector<1x128xf32>
    %31 = arith.addf %27, %30 : vector<1x128xf32>
    %32 = math.rsqrt %31 : vector<1x128xf32>
    %33 = vector.broadcast %32 : vector<1x128xf32> to vector<16x128xf32>
    %34 = arith.mulf %29, %33 : vector<16x128xf32>
    %c0_17 = arith.constant 0 : index
    %c0_18 = arith.constant 0 : index
    %35 = vector.load %arg5[%c0_17, %c0_18] : memref<1x128xf32, #tpu.memory_space<vmem>>, vector<1x128xf32>
    %36 = vector.broadcast %35 : vector<1x128xf32> to vector<16x128xf32>
    %37 = arith.mulf %34, %36 : vector<16x128xf32>
    %c0_19 = arith.constant 0 : index
    %c0_20 = arith.constant 0 : index
    %38 = vector.load %arg6[%c0_19, %c0_20] : memref<1x128xf32, #tpu.memory_space<vmem>>, vector<1x128xf32>
    %39 = vector.broadcast %38 : vector<1x128xf32> to vector<16x128xf32>
    %40 = arith.addf %37, %39 : vector<16x128xf32>
    %cst_21 = arith.constant 0.000000e+00 : f32
    %41 = vector.broadcast %cst_21 : f32 to vector<16x128xf32>
    %42 = arith.maximumf %40, %41 : vector<16x128xf32>
    %43 = arith.truncf %42 : vector<16x128xf32> to vector<16x128xbf16>
    %c0_22 = arith.constant 0 : index
    %c0_23 = arith.constant 0 : index
    %44 = vector.load %arg7[%c0_22, %c0_23] : memref<16x128xbf16, #tpu.memory_space<vmem>>, vector<16x128xbf16>
    tpu.vector_store %arg7[%c0_22, %c0_23], %43 {strides = array<i32>} : memref<16x128xbf16, #tpu.memory_space<vmem>>, vector<16x128xbf16>,
    return
  }
}

</mosaic_0001>

<bundles_post_ra>
// kernel: tpu_custom_call.1
= control target key start
LH: loop header
LB: loop body
LE: loop exit
PB: predicated region body
PF: predicated region fallthrough
CT: control target
= control target key end

     0   :  { %vm44_vm0 = vcmask 1041408   ;;  %v300_v1 = vmov 0.0   ;;  %vm301_vm1 = vmmov 0   ;;  %vm40_vm2 = vcmask 31744   ;;  %s378_s0 = inlined_call_operand.vmem [shape: bf16[16,16], index: 0, kind: input, shape index: {}]   ;;  %s379_s1 = inlined_call_operand.vmem [shape: bf16[16,4], index: 1, kind: input, shape index: {}]   ;;  %s380_s2 = inlined_call_operand.vmem [shape: bf16[16,128], index: 2, kind: input, shape index: {}]   ;;  %s381_s3 = inlined_call_operand.vmem [shape: bf16[4,128], index: 3, kind: input, shape index: {}]   ;;  %s382_s4 = inlined_call_operand.vmem [shape: f32[1,128], index: 4, kind: input, shape index: {}]   ;;  %s383_s5 = inlined_call_operand.vmem [shape: f32[1,128], index: 5, kind: input, shape index: {}]   ;;  %s384_s6 = inlined_call_operand.vmem [shape: f32[1,128], index: 6, kind: input, shape index: {}]   ;;  %s385_s7 = inlined_call_operand.hbm [shape: bf16[16,128], index: 7, kind: output, shape index: {}]  }
   0x1   :  { %v34_v0 = vld [vmem:[%s381_s3] sm:$0x3]  ;;  %254 = vmatprep.subr.bf16.mxu0 %v300_v1  ;;  %260 = vmatprep.subr.bf16.mxu1 %v300_v1  ;;  %vm100_vm3 = vcmask 130048  }
   0x2   :  { %v46_v2 = vsel %vm44_vm0, %v34_v0, 0  ;;  %v271_v3 = vld [vmem:[%s380_s2] sm:$0xff]   ;;  %256 = vmatprep.mubr.msk.bf16.mxu0 %vm301_vm1, %v300_v1  ;;  %262 = vmatprep.mubr.msk.bf16.mxu1 %vm301_vm1, %v300_v1 }
   0x3   :  { %v272_v4 = vld [vmem:[%s379_s1] sm:$0xff]   ;;  %255 = vmatpush3.bf16.msra.mxu0 %v46_v2  ;;  %261 = vmatpush3.bf16.msra.mxu1 %v271_v3 }
   0x4   :  { %v273_v5 = vld [vmem:[%s378_s0] sm:$0xff]  }
   0x5   :  { %12 = vsyncpa [#allocation3], 0  ;;  %v238_v9 = vld [vmem:[%s382_s4] ss:$0 sm:$0xff]  ;;  %s302_s10 = smov [#allocation2]  }
   0x6   :  { %257 = vmatmul.mubr.msk.bf16.vlgmr.msra.gmra.mrb[0].mxu0 %vm40_vm2, %v272_v4  ;;  %263 = vmatmul.mubr.msk.bf16.vlgmr.msra.gmra.mrb[0].mxu1 %vm100_vm3, %v273_v5  ;;  %v239_v38 = vld [vmem:[%s383_s5] ss:$0 sm:$0xff]  ;;  %s222_s11 = sshll.u32 %s302_s10, 4  ;;  %s223_s11 = int_to_ptr.vmem [resolvable:$true] %s222_s11 }
   0x7   :  { %v240_v41 = vld [vmem:[%s384_s6] ss:$0 sm:$0xff]  ;;  %s276_s12 = scalar_lea.vmem %s223_s11, 128  ;;  %p281_p1 = scmp.lt.s32.totalorder %s223_s11, %s223_s11 }
   0x8   :  { %p277_p0 = scmp.ne.s32.totalorder %s223_s11, %s276_s12  ;;  %p282_p2 = scmp.lt.s32.totalorder %s276_s12, %s276_s12 }
   0xa   :  { %p283_p3 = por %p282_p2, %p281_p1 }
   0xc   :  { %p284_p4 = pnand %p283_p3, %p277_p0 }
  0xd9   :  { %v82_v6 = vpop.f32.mrb[0].mxu0  ;;  %v138_v8 = vpop.f32.mrb[0].mxu1 }
  0xda   :  { %v258_v7 = vpop.f32.mrb[1].mxu0  ;;  %v139_v10 = vadd.f32 %v138_v8, %v82_v6  ;;  %v264_v12 = vpop.f32.mrb[1].mxu1 }
  0xdb   :  { %v85_v11 = vpop.f32.mrb[2].mxu0  ;;  %v141_v14 = vpop.f32.mrb[2].mxu1 }
  0xdc   :  { %v259_v13 = vpop.f32.mrb[3].mxu0  ;;  %v152_v15 = vadd.f32 %v238_v9, %v139_v10  ;;  %v142_v16 = vadd.f32 %v141_v14, %v85_v11  ;;  %v265_v17 = vpop.f32.mrb[3].mxu1 }
  0xde   :  { %v162_v18 = vrot.slane %v152_v15, 4  ;;  %v153_v24 = vadd.f32 %v238_v9, %v142_v16 }
  0xe0   :  { %v163_v19 = vadd.f32 %v162_v18, %v152_v15 }
  0xe2   :  { %v164_v20 = vrot.slane %v163_v19, 2 }
  0xe4   :  { %v165_v21 = vadd.f32 %v164_v20, %v163_v19 }
  0xe6   :  { %v166_v22 = vrot.slane %v165_v21, 1 }
  0xe8   :  { %v167_v23 = vadd.f32 %v166_v22, %v165_v21 }
  0xea   :  { %v168_v25 = vmul.f32 0.125, %v167_v23 }
  0xec   :  { %v169_v26 = vsub.f32 %v152_v15, %v168_v25  ;;  %v170_v27 = vsub.f32 %v153_v24, %v168_v25 }
  0xee   :  { %v173_v28 = vmul.f32 %v169_v26, %v169_v26 }
  0xf0   :  { %v176_v29 = vrot.slane %v173_v28, 4 }
  0xf2   :  { %v177_v30 = vadd.f32 %v176_v29, %v173_v28 }
  0xf4   :  { %v178_v31 = vrot.slane %v177_v30, 2 }
  0xf6   :  { %v179_v32 = vadd.f32 %v178_v31, %v177_v30 }
  0xf8   :  { %v180_v33 = vrot.slane %v179_v32, 1 }
  0xfa   :  { %v181_v34 = vadd.f32 %v180_v33, %v179_v32 }
  0xfc   :  { %v182_v35 = vmul.f32 0.125, %v181_v34 }
  0xfe   :  { %v183_v36 = vadd.f32 0.001, %v182_v35 }
 0x100   :  { %274 = vrsqrt.f32 %v183_v36 }
 0x10a   :  { %v275_v37 = vpop.eup %274 }
 0x10b   :  { %v185_v39 = vmul.f32 %v275_v37, %v169_v26  ;;  %v186_v40 = vmul.f32 %v275_v37, %v170_v27 }
 0x10d   :  { %v194_v42 = vmul.f32 %v239_v38, %v185_v39  ;;  %v195_v43 = vmul.f32 %v239_v38, %v186_v40 }
 0x10f   :  { %v203_v44 = vadd.f32 %v240_v41, %v194_v42  ;;  %v204_v45 = vadd.f32 %v240_v41, %v195_v43 }
 0x111   :  { %v205_v46 = vmax.f32 %v203_v44, 0.0  ;;  %v206_v47 = vmax.f32 %v204_v45, 0.0 }
 0x113   :  { %v248_v48 = vpack.c.bf16 %v206_v47, %v205_v46 }
 0x115   :  { %249 = vst [vmem:[#allocation2] sm:$0xff] %v248_v48  }
 0x116   :  { %287 = shalt.err (!%p284_p4)
}
 0x117   :  { %s288_s13 = scalar_lea.hbm %s385_s7, 128 }
 0x118   :  { %p289_p5 = scmp.ne.s32.totalorder %s385_s7, %s288_s13  ;;  %p292_p6 = scmp.lt.u32.totalorder %s288_s13, %s385_s7 }
 0x11a   :  { %p294_p7 = pnand %p292_p6, %p289_p5 }
 0x11c   :  { %297 = shalt.err (!%p294_p7)
}
 0x11d   :  { %s303_s18 = smov 64   ;;  %s304_s19 = smov 4  }
 0x11e   :  { %228 = dma.vmem_to_hbm [thread:$0]  %s223_s11, 128, %s385_s7, [#allocation3], %s303_s18, %s303_s18, %s304_s19  }
 0x11f   :  { %298 = dma.done.wait [#allocation3], 128  }
 0x120   :  { %299 = vsyncadd [#allocation3], 4294967168 }
 0x121   :  { %232 = vsyncpa [#allocation3], 1 }

</bundles_post_ra>
